<compile_context>
chip_gen: v7x
topology: tpu7x:2x2x1
jax: 0.10.0
libtpu: 0.0.40
codegen_flags: <defaults>
</compile_context>

<pallas_src>
import functools

import jax
import jax.numpy as jnp
from jax.experimental import pallas as pl
from jax.experimental.pallas import tpu as pltpu

NUM_CIRCLES = 8
NEURONS_PER_CIRCLE = 4
HIDDEN = NEURONS_PER_CIRCLE * NUM_CIRCLES  # 32
IN_FEATURES = 2
LANE = 128
POINTS_PER_ROW = LANE // NUM_CIRCLES       # 16 points x 8 logits = one 128-lane row


def _round_up(n, m):
    return (n + m - 1) // m * m


def _device_kind():
    try:
        return jax.devices()[0].device_kind.lower()
    except Exception:
        return ""


def _mlp_kernel(x_ref, w1_ref, b1_ref, w2_ref, b2_ref, w3_ref, b3_ref, o_ref,
                *, interleave_out):
    """Lane-dense fused MLP forward.

    x_ref : (2, bb)   f32     w1_ref: (32, 2)  f32    b1_ref: (32, 1) f32
    w2_ref: (32, 32)  bf16    b2_ref: (32, 1)  f32
    w3_ref: (8, 32)   bf16    b3_ref: (8, 1)   f32
    o_ref : (bb//16, 128) f32  if interleave_out else (8, bb) f32
    """
    x = x_ref[...]                          # (2, bb)
    w1 = w1_ref[...]                        # (32, 2)

    # Layer 1 (K=2): two VPU broadcast FMAs; ReLU fused with the bf16 downcast so the
    # full-width f32 activation does not stay live.
    h1 = w1[:, 0:1] * x[0:1, :] + w1[:, 1:2] * x[1:2, :] + b1_ref[...]
    h1 = jnp.maximum(h1, 0.0).astype(jnp.bfloat16)          # (32, bb)

    # Layer 2 (K=32): bf16 MXU matmul, f32 accumulate, bias/ReLU in f32.
    h2 = jnp.dot(w2_ref[...], h1, preferred_element_type=jnp.float32) + b2_ref[...]
    h2 = jnp.maximum(h2, 0.0).astype(jnp.bfloat16)          # (32, bb)

    # Layer 3 (K=32): bf16 MXU matmul, f32 accumulate.
    out = jnp.dot(w3_ref[...], h2, preferred_element_type=jnp.float32) + b3_ref[...]

    if interleave_out:
        # (8, bb) -> (bb, 8) -> (bb//16, 128): a lane-dense, unmasked store whose HBM
        # layout is already (batch, 8) row-major, so no XLA transpose pass is needed
        # after the kernel.  The transpose/regroup rides the XLU, which has slack.
        o_ref[...] = out.T.reshape(o_ref.shape).astype(o_ref.dtype)
    else:
        o_ref[...] = out.astype(o_ref.dtype)                # (8, bb) feature-major


@functools.partial(jax.jit, static_argnames=("block_b", "optimized"))
def _forward_impl(x, params, *, block_b, optimized):
    w1, b1, w2, b2, w3, b3 = params
    B = x.shape[0]
    kind = _device_kind()

    # Batch lives on the lane (last) dim: pick a 128-multiple block.
    bb = _round_up(min(block_b, _round_up(B, LANE)), LANE)
    if "v7" in kind:
        # Keep >= 2 batch blocks so the core-parallel axis can feed both TensorCores.
        bb = min(bb, max(LANE, _round_up((B + 1) // 2, LANE)))
    grid_b = pl.cdiv(B, bb)

    xt = x.T.astype(jnp.float32)            # (2, B)

    if "v7" in kind and grid_b >= 2:
        batch_sem = pltpu.CORE_PARALLEL     # really shard the batch over both TCs
    else:
        batch_sem = "parallel"

    kernel = functools.partial(_mlp_kernel, interleave_out=optimized)

    # Weights/biases are ~3 KB total: constant index_map keeps them resident in VMEM
    # (the pipeline skips the re-DMA when the block index does not change).
    full = lambda shape: pl.BlockSpec(shape, lambda i: (0, 0))
    in_specs = [
        pl.BlockSpec((IN_FEATURES, bb), lambda i: (0, i)),   # x tile (ragged edge OK)
        full((HIDDEN, IN_FEATURES)),     # w1 (f32)
        full((HIDDEN, 1)),               # b1
        full((HIDDEN, HIDDEN)),          # w2 (bf16)
        full((HIDDEN, 1)),               # b2
        full((NUM_CIRCLES, HIDDEN)),     # w3 (bf16)
        full((NUM_CIRCLES, 1)),          # b3
    ]
    cparams = pltpu.CompilerParams(
        dimension_semantics=(batch_sem,),
        vmem_limit_bytes=32 * 1024 * 1024,   # raises v5e's 16 MiB default; safe everywhere
    )

    if optimized:
        # Output HBM array (rows, 128) is (batch, 8) row-major in disguise.
        rows = max(pl.cdiv(B, POINTS_PER_ROW), bb // POINTS_PER_ROW)
        out2d = pl.pallas_call(
            kernel,
            out_shape=jax.ShapeDtypeStruct((rows, LANE), jnp.float32),
            grid_spec=pl.GridSpec(
                grid=(grid_b,),
                in_specs=in_specs,
                out_specs=pl.BlockSpec((bb // POINTS_PER_ROW, LANE), lambda i: (i, 0)),
            ),
            compiler_params=cparams,
        )(xt, w1, b1, w2, b2, w3, b3)
        # Free reshape to (rows*16, 8); the [:B] slice only costs when B is ragged.
        return out2d.reshape(rows * POINTS_PER_ROW, NUM_CIRCLES)[:B]

    # ---- known-good fallback path (padded batch, feature-major output) ----
    b_pad = grid_b * bb
    if b_pad != B:
        xt = jnp.pad(xt, ((0, 0), (0, b_pad - B)))
    out_t = pl.pallas_call(
        kernel,
        out_shape=jax.ShapeDtypeStruct((NUM_CIRCLES, b_pad), jnp.float32),
        grid_spec=pl.GridSpec(
            grid=(grid_b,),
            in_specs=in_specs,
            out_specs=pl.BlockSpec((NUM_CIRCLES, bb), lambda i: (0, i)),
        ),
        compiler_params=cparams,
    )(xt, w1, b1, w2, b2, w3, b3)
    return out_t[:, :B].T


_OPTIMIZED_PATH_OK = None  # tri-state: None = untested, True / False = cached result


def circle_model_forward(x, params, block_b=8192):
    """x: (B, 2) float32 -> logits (B, NUM_CIRCLES) float32."""
    global _OPTIMIZED_PATH_OK
    if _OPTIMIZED_PATH_OK is not False:
        try:
            out = _forward_impl(x, params, block_b=block_b, optimized=True)
            _OPTIMIZED_PATH_OK = True
            return out
        except Exception:
            _OPTIMIZED_PATH_OK = False
    return _forward_impl(x, params, block_b=block_b, optimized=False)


def init_params(key):
    """Deterministic Linear-style init (uniform +-1/sqrt(fan_in)), PyTorch (out, in) layout."""
    def linear_init(k, fan_in, fan_out, w_dtype):
        kw, kb = jax.random.split(k)
        bound = 1.0 / jnp.sqrt(fan_in)
        w = jax.random.uniform(kw, (fan_out, fan_in), jnp.float32, -bound, bound)
        b = jax.random.uniform(kb, (fan_out, 1), jnp.float32, -bound, bound)
        return w.astype(w_dtype), b

    k1, k2, k3 = jax.random.split(key, 3)
    w1, b1 = linear_init(k1, IN_FEATURES, HIDDEN, jnp.float32)    # K=2 layer stays f32 (VPU)
    w2, b2 = linear_init(k2, HIDDEN, HIDDEN, jnp.bfloat16)        # MXU layers stored bf16
    w3, b3 = linear_init(k3, HIDDEN, NUM_CIRCLES, jnp.bfloat16)
    return (w1, b1, w2, b2, w3, b3)


def reference_forward(x, params):
    """Pure-JAX reference using the same precision scheme as the kernel.
    (Parity vs a full-f32 PyTorch CircleModel is ~0.3-1% relative due to bf16 MXU inputs.)"""
    w1, b1, w2, b2, w3, b3 = params
    xt = x.T.astype(jnp.float32)
    h1 = jnp.maximum(w1[:, 0:1] * xt[0:1, :] + w1[:, 1:2] * xt[1:2, :] + b1, 0.0)
    h1 = h1.astype(jnp.bfloat16)
    h2 = jnp.maximum(jnp.dot(w2, h1, preferred_element_type=jnp.float32) + b2, 0.0)
    h2 = h2.astype(jnp.bfloat16)
    out = jnp.dot(w3, h2, preferred_element_type=jnp.float32) + b3
    return out.T


# TODO(synk): train_model / evaluate / train_and_evaluate (DataLoader, Adam,
# BCEWithLogitsLoss loop) and the CircleSet dataset are host-side training utilities
# with no Pallas equivalent; only the forward pass is implemented here.

if __name__ == "__main__":
    key = jax.random.PRNGKey(0)
    k_params, k_x = jax.random.split(key)

    params = init_params(k_params)
    # Synthetic "circle set": 500 points in [0, 100] x [0, 100] (dataset numPoints=500).
    B = 500
    x = jax.random.uniform(k_x, (B, IN_FEATURES), jnp.float32, 0.0, 100.0)

    ref = reference_forward(x, params)

    # Default (large) block: single fat grid step, ragged lanes handled by Pallas.
    out = jax.block_until_ready(circle_model_forward(x, params))
    assert out.shape == (B, NUM_CIRCLES)
    assert jnp.allclose(out, ref, atol=5e-2, rtol=1e-2), "mismatch vs. reference (default block)"

    # Small block: forces a 4-step grid with a ragged final block (exercises the
    # multi-block pipeline, edge clipping, and the in-kernel output interleave).
    out_small = jax.block_until_ready(circle_model_forward(x, params, block_b=128))
    assert out_small.shape == (B, NUM_CIRCLES)
    assert jnp.allclose(out_small, ref, atol=5e-2, rtol=1e-2), "mismatch vs. reference (block_b=128)"

    print("KERNEL_OK")
</pallas_src>

<mosaic_0001>
module attributes {stable_mosaic.version = 11 : i64} {
  func.func @_mlp_kernel(%arg0: i32, %arg1: memref<2x512xf32, #tpu.memory_space<vmem>>, %arg2: memref<32x2xf32, #tpu.memory_space<vmem>>, %arg3: memref<32x1xf32, #tpu.memory_space<vmem>>, %arg4: memref<32x32xbf16, #tpu.memory_space<vmem>>, %arg5: memref<32x1xf32, #tpu.memory_space<vmem>>, %arg6: memref<8x32xbf16, #tpu.memory_space<vmem>>, %arg7: memref<8x1xf32, #tpu.memory_space<vmem>>, %arg8: memref<32x128xf32, #tpu.memory_space<vmem>>) attributes {dimension_semantics = [#tpu.dimension_semantics<parallel>], iteration_bounds = array<i64: 1>, scalar_prefetch = 0 : i64, scratch_operands = 0 : i64, tpu.core_type = #tpu.core_type<tc>, window_params = [{transform_indices = @transform_0, window_bounds = array<i64: 2, 512>}, {pipeline_mode = #tpu.pipeline_mode<synchronous>, transform_indices = @transform_1, window_bounds = array<i64: 32, 2>}, {pipeline_mode = #tpu.pipeline_mode<synchronous>, transform_indices = @transform_2, window_bounds = array<i64: 32, 1>}, {pipeline_mode = #tpu.pipeline_mode<synchronous>, transform_indices = @transform_3, window_bounds = array<i64: 32, 32>}, {pipeline_mode = #tpu.pipeline_mode<synchronous>, transform_indices = @transform_4, window_bounds = array<i64: 32, 1>}, {pipeline_mode = #tpu.pipeline_mode<synchronous>, transform_indices = @transform_5, window_bounds = array<i64: 8, 32>}, {pipeline_mode = #tpu.pipeline_mode<synchronous>, transform_indices = @transform_6, window_bounds = array<i64: 8, 1>}, {transform_indices = @transform_7, window_bounds = array<i64: 32, 128>}]} {
    %c0 = arith.constant 0 : index
    %c0_0 = arith.constant 0 : index
    %0 = vector.load %arg1[%c0, %c0_0] : memref<2x512xf32, #tpu.memory_space<vmem>>, vector<2x512xf32>
    %c0_1 = arith.constant 0 : index
    %c0_2 = arith.constant 0 : index
    %1 = vector.load %arg2[%c0_1, %c0_2] : memref<32x2xf32, #tpu.memory_space<vmem>>, vector<32x2xf32>
    %2 = vector.extract_strided_slice %1 {offsets = [0, 0], sizes = [32, 1], strides = [1, 1]} : vector<32x2xf32> to vector<32x1xf32>
    %3 = vector.extract_strided_slice %0 {offsets = [0, 0], sizes = [1, 512], strides = [1, 1]} : vector<2x512xf32> to vector<1x512xf32>
    %4 = vector.broadcast %2 : vector<32x1xf32> to vector<32x512xf32>
    %5 = vector.broadcast %3 : vector<1x512xf32> to vector<32x512xf32>
    %6 = arith.mulf %4, %5 : vector<32x512xf32>
    %7 = vector.extract_strided_slice %1 {offsets = [0, 1], sizes = [32, 1], strides = [1, 1]} : vector<32x2xf32> to vector<32x1xf32>
    %8 = vector.extract_strided_slice %0 {offsets = [1, 0], sizes = [1, 512], strides = [1, 1]} : vector<2x512xf32> to vector<1x512xf32>
    %9 = vector.broadcast %7 : vector<32x1xf32> to vector<32x512xf32>
    %10 = vector.broadcast %8 : vector<1x512xf32> to vector<32x512xf32>
    %11 = arith.mulf %9, %10 : vector<32x512xf32>
    %12 = arith.addf %6, %11 : vector<32x512xf32>
    %c0_3 = arith.constant 0 : index
    %c0_4 = arith.constant 0 : index
    %13 = vector.load %arg3[%c0_3, %c0_4] : memref<32x1xf32, #tpu.memory_space<vmem>>, vector<32x1xf32>
    %14 = vector.broadcast %13 : vector<32x1xf32> to vector<32x512xf32>
    %15 = arith.addf %12, %14 : vector<32x512xf32>
    %cst = arith.constant 0.000000e+00 : f32
    %16 = vector.broadcast %cst : f32 to vector<32x512xf32>
    %17 = arith.maximumf %15, %16 : vector<32x512xf32>
    %18 = arith.truncf %17 : vector<32x512xf32> to vector<32x512xbf16>
    %c0_5 = arith.constant 0 : index
    %c0_6 = arith.constant 0 : index
    %19 = vector.load %arg4[%c0_5, %c0_6] : memref<32x32xbf16, #tpu.memory_space<vmem>>, vector<32x32xbf16>
    %cst_7 = arith.constant dense<0.000000e+00> : vector<32x512xf32>
    %20 = tpu.matmul %19, %18, %cst_7 {dimension_numbers = #tpu.dot_dimension_numbers<[1], [0], [0], [1], [0, 0, 1, 1], [], []>} : vector<32x32xbf16>, vector<32x512xbf16>, vector<32x512xf32> -> vector<32x512xf32>
    %c0_8 = arith.constant 0 : index
    %c0_9 = arith.constant 0 : index
    %21 = vector.load %arg5[%c0_8, %c0_9] : memref<32x1xf32, #tpu.memory_space<vmem>>, vector<32x1xf32>
    %22 = vector.broadcast %21 : vector<32x1xf32> to vector<32x512xf32>
    %23 = arith.addf %20, %22 : vector<32x512xf32>
    %cst_10 = arith.constant 0.000000e+00 : f32
    %24 = vector.broadcast %cst_10 : f32 to vector<32x512xf32>
    %25 = arith.maximumf %23, %24 : vector<32x512xf32>
    %26 = arith.truncf %25 : vector<32x512xf32> to vector<32x512xbf16>
    %c0_11 = arith.constant 0 : index
    %c0_12 = arith.constant 0 : index
    %27 = vector.load %arg6[%c0_11, %c0_12] : memref<8x32xbf16, #tpu.memory_space<vmem>>, vector<8x32xbf16>
    %cst_13 = arith.constant dense<0.000000e+00> : vector<8x512xf32>
    %28 = tpu.matmul %27, %26, %cst_13 {dimension_numbers = #tpu.dot_dimension_numbers<[1], [0], [0], [1], [0, 0, 1, 1], [], []>} : vector<8x32xbf16>, vector<32x512xbf16>, vector<8x512xf32> -> vector<8x512xf32>
    %c0_14 = arith.constant 0 : index
    %c0_15 = arith.constant 0 : index
    %29 = vector.load %arg7[%c0_14, %c0_15] : memref<8x1xf32, #tpu.memory_space<vmem>>, vector<8x1xf32>
    %30 = vector.broadcast %29 : vector<8x1xf32> to vector<8x512xf32>
    %31 = arith.addf %28, %30 : vector<8x512xf32>
    %32 = tpu.transpose %31, [1, 0] : vector<8x512xf32> -> vector<512x8xf32>
    %33 = vector.shape_cast %32 : vector<512x8xf32> to vector<32x128xf32>
    %c0_16 = arith.constant 0 : index
    %c0_17 = arith.constant 0 : index
    %34 = vector.load %arg8[%c0_16, %c0_17] : memref<32x128xf32, #tpu.memory_space<vmem>>, vector<32x128xf32>
    tpu.vector_store %arg8[%c0_16, %c0_17], %33 {strides = array<i32>} : memref<32x128xf32, #tpu.memory_space<vmem>>, vector<32x128xf32>,
    return
  }
  func.func @transform_0(%arg0: i32) -> (i32, i32) {
    %c0_i32 = arith.constant 0 : i32
    %c0_i32_0 = arith.constant 0 : i32
    return %c0_i32, %arg0 : i32, i32
  }
  func.func @transform_1(%arg0: i32) -> (i32, i32) {
    %c0_i32 = arith.constant 0 : i32
    %c0_i32_0 = arith.constant 0 : i32
    %c0_i32_1 = arith.constant 0 : i32
    return %c0_i32, %c0_i32_0 : i32, i32
  }
  func.func @transform_2(%arg0: i32) -> (i32, i32) {
    %c0_i32 = arith.constant 0 : i32
    %c0_i32_0 = arith.constant 0 : i32
    %c0_i32_1 = arith.constant 0 : i32
    return %c0_i32, %c0_i32_0 : i32, i32
  }
  func.func @transform_3(%arg0: i32) -> (i32, i32) {
    %c0_i32 = arith.constant 0 : i32
    %c0_i32_0 = arith.constant 0 : i32
    %c0_i32_1 = arith.constant 0 : i32
    return %c0_i32, %c0_i32_0 : i32, i32
  }
  func.func @transform_4(%arg0: i32) -> (i32, i32) {
    %c0_i32 = arith.constant 0 : i32
    %c0_i32_0 = arith.constant 0 : i32
    %c0_i32_1 = arith.constant 0 : i32
    return %c0_i32, %c0_i32_0 : i32, i32
  }
  func.func @transform_5(%arg0: i32) -> (i32, i32) {
    %c0_i32 = arith.constant 0 : i32
    %c0_i32_0 = arith.constant 0 : i32
    %c0_i32_1 = arith.constant 0 : i32
    return %c0_i32, %c0_i32_0 : i32, i32
  }
  func.func @transform_6(%arg0: i32) -> (i32, i32) {
    %c0_i32 = arith.constant 0 : i32
    %c0_i32_0 = arith.constant 0 : i32
    %c0_i32_1 = arith.constant 0 : i32
    return %c0_i32, %c0_i32_0 : i32, i32
  }
  func.func @transform_7(%arg0: i32) -> (i32, i32) {
    %c0_i32 = arith.constant 0 : i32
    %c0_i32_0 = arith.constant 0 : i32
    return %arg0, %c0_i32 : i32, i32
  }
}

module attributes {stable_mosaic.version = 11 : i64} {
  func.func @_mlp_kernel(%arg0: i32, %arg1: memref<2x512xf32, #tpu.memory_space<vmem>>, %arg2: memref<32x2xf32, #tpu.memory_space<vmem>>, %arg3: memref<32x1xf32, #tpu.memory_space<vmem>>, %arg4: memref<32x32xbf16, #tpu.memory_space<vmem>>, %arg5: memref<32x1xf32, #tpu.memory_space<vmem>>, %arg6: memref<8x32xbf16, #tpu.memory_space<vmem>>, %arg7: memref<8x1xf32, #tpu.memory_space<vmem>>, %arg8: memref<8x512xf32, #tpu.memory_space<vmem>>) attributes {dimension_semantics = [#tpu.dimension_semantics<parallel>], iteration_bounds = array<i64: 1>, scalar_prefetch = 0 : i64, scratch_operands = 0 : i64, tpu.core_type = #tpu.core_type<tc>, window_params = [{transform_indices = @transform_0, window_bounds = array<i64: 2, 512>}, {pipeline_mode = #tpu.pipeline_mode<synchronous>, transform_indices = @transform_1, window_bounds = array<i64: 32, 2>}, {pipeline_mode = #tpu.pipeline_mode<synchronous>, transform_indices = @transform_2, window_bounds = array<i64: 32, 1>}, {pipeline_mode = #tpu.pipeline_mode<synchronous>, transform_indices = @transform_3, window_bounds = array<i64: 32, 32>}, {pipeline_mode = #tpu.pipeline_mode<synchronous>, transform_indices = @transform_4, window_bounds = array<i64: 32, 1>}, {pipeline_mode = #tpu.pipeline_mode<synchronous>, transform_indices = @transform_5, window_bounds = array<i64: 8, 32>}, {pipeline_mode = #tpu.pipeline_mode<synchronous>, transform_indices = @transform_6, window_bounds = array<i64: 8, 1>}, {transform_indices = @transform_7, window_bounds = array<i64: 8, 512>}]} {
    %c0 = arith.constant 0 : index
    %c0_0 = arith.constant 0 : index
    %0 = vector.load %arg1[%c0, %c0_0] : memref<2x512xf32, #tpu.memory_space<vmem>>, vector<2x512xf32>
    %c0_1 = arith.constant 0 : index
    %c0_2 = arith.constant 0 : index
    %1 = vector.load %arg2[%c0_1, %c0_2] : memref<32x2xf32, #tpu.memory_space<vmem>>, vector<32x2xf32>
    %2 = vector.extract_strided_slice %1 {offsets = [0, 0], sizes = [32, 1], strides = [1, 1]} : vector<32x2xf32> to vector<32x1xf32>
    %3 = vector.extract_strided_slice %0 {offsets = [0, 0], sizes = [1, 512], strides = [1, 1]} : vector<2x512xf32> to vector<1x512xf32>
    %4 = vector.broadcast %2 : vector<32x1xf32> to vector<32x512xf32>
    %5 = vector.broadcast %3 : vector<1x512xf32> to vector<32x512xf32>
    %6 = arith.mulf %4, %5 : vector<32x512xf32>
    %7 = vector.extract_strided_slice %1 {offsets = [0, 1], sizes = [32, 1], strides = [1, 1]} : vector<32x2xf32> to vector<32x1xf32>
    %8 = vector.extract_strided_slice %0 {offsets = [1, 0], sizes = [1, 512], strides = [1, 1]} : vector<2x512xf32> to vector<1x512xf32>
    %9 = vector.broadcast %7 : vector<32x1xf32> to vector<32x512xf32>
    %10 = vector.broadcast %8 : vector<1x512xf32> to vector<32x512xf32>
    %11 = arith.mulf %9, %10 : vector<32x512xf32>
    %12 = arith.addf %6, %11 : vector<32x512xf32>
    %c0_3 = arith.constant 0 : index
    %c0_4 = arith.constant 0 : index
    %13 = vector.load %arg3[%c0_3, %c0_4] : memref<32x1xf32, #tpu.memory_space<vmem>>, vector<32x1xf32>
    %14 = vector.broadcast %13 : vector<32x1xf32> to vector<32x512xf32>
    %15 = arith.addf %12, %14 : vector<32x512xf32>
    %cst = arith.constant 0.000000e+00 : f32
    %16 = vector.broadcast %cst : f32 to vector<32x512xf32>
    %17 = arith.maximumf %15, %16 : vector<32x512xf32>
    %18 = arith.truncf %17 : vector<32x512xf32> to vector<32x512xbf16>
    %c0_5 = arith.constant 0 : index
    %c0_6 = arith.constant 0 : index
    %19 = vector.load %arg4[%c0_5, %c0_6] : memref<32x32xbf16, #tpu.memory_space<vmem>>, vector<32x32xbf16>
    %cst_7 = arith.constant dense<0.000000e+00> : vector<32x512xf32>
    %20 = tpu.matmul %19, %18, %cst_7 {dimension_numbers = #tpu.dot_dimension_numbers<[1], [0], [0], [1], [0, 0, 1, 1], [], []>} : vector<32x32xbf16>, vector<32x512xbf16>, vector<32x512xf32> -> vector<32x512xf32>
    %c0_8 = arith.constant 0 : index
    %c0_9 = arith.constant 0 : index
    %21 = vector.load %arg5[%c0_8, %c0_9] : memref<32x1xf32, #tpu.memory_space<vmem>>, vector<32x1xf32>
    %22 = vector.broadcast %21 : vector<32x1xf32> to vector<32x512xf32>
    %23 = arith.addf %20, %22 : vector<32x512xf32>
    %cst_10 = arith.constant 0.000000e+00 : f32
    %24 = vector.broadcast %cst_10 : f32 to vector<32x512xf32>
    %25 = arith.maximumf %23, %24 : vector<32x512xf32>
    %26 = arith.truncf %25 : vector<32x512xf32> to vector<32x512xbf16>
    %c0_11 = arith.constant 0 : index
    %c0_12 = arith.constant 0 : index
    %27 = vector.load %arg6[%c0_11, %c0_12] : memref<8x32xbf16, #tpu.memory_space<vmem>>, vector<8x32xbf16>
    %cst_13 = arith.constant dense<0.000000e+00> : vector<8x512xf32>
    %28 = tpu.matmul %27, %26, %cst_13 {dimension_numbers = #tpu.dot_dimension_numbers<[1], [0], [0], [1], [0, 0, 1, 1], [], []>} : vector<8x32xbf16>, vector<32x512xbf16>, vector<8x512xf32> -> vector<8x512xf32>
    %c0_14 = arith.constant 0 : index
    %c0_15 = arith.constant 0 : index
    %29 = vector.load %arg7[%c0_14, %c0_15] : memref<8x1xf32, #tpu.memory_space<vmem>>, vector<8x1xf32>
    %30 = vector.broadcast %29 : vector<8x1xf32> to vector<8x512xf32>
    %31 = arith.addf %28, %30 : vector<8x512xf32>
    %c0_16 = arith.constant 0 : index
    %c0_17 = arith.constant 0 : index
    %32 = vector.load %arg8[%c0_16, %c0_17] : memref<8x512xf32, #tpu.memory_space<vmem>>, vector<8x512xf32>
    tpu.vector_store %arg8[%c0_16, %c0_17], %31 {strides = array<i32>} : memref<8x512xf32, #tpu.memory_space<vmem>>, vector<8x512xf32>,
    return
  }
  func.func @transform_0(%arg0: i32) -> (i32, i32) {
    %c0_i32 = arith.constant 0 : i32
    %c0_i32_0 = arith.constant 0 : i32
    return %c0_i32, %arg0 : i32, i32
  }
  func.func @transform_1(%arg0: i32) -> (i32, i32) {
    %c0_i32 = arith.constant 0 : i32
    %c0_i32_0 = arith.constant 0 : i32
    %c0_i32_1 = arith.constant 0 : i32
    return %c0_i32, %c0_i32_0 : i32, i32
  }
  func.func @transform_2(%arg0: i32) -> (i32, i32) {
    %c0_i32 = arith.constant 0 : i32
    %c0_i32_0 = arith.constant 0 : i32
    %c0_i32_1 = arith.constant 0 : i32
    return %c0_i32, %c0_i32_0 : i32, i32
  }
  func.func @transform_3(%arg0: i32) -> (i32, i32) {
    %c0_i32 = arith.constant 0 : i32
    %c0_i32_0 = arith.constant 0 : i32
    %c0_i32_1 = arith.constant 0 : i32
    return %c0_i32, %c0_i32_0 : i32, i32
  }
  func.func @transform_4(%arg0: i32) -> (i32, i32) {
    %c0_i32 = arith.constant 0 : i32
    %c0_i32_0 = arith.constant 0 : i32
    %c0_i32_1 = arith.constant 0 : i32
    return %c0_i32, %c0_i32_0 : i32, i32
  }
  func.func @transform_5(%arg0: i32) -> (i32, i32) {
    %c0_i32 = arith.constant 0 : i32
    %c0_i32_0 = arith.constant 0 : i32
    %c0_i32_1 = arith.constant 0 : i32
    return %c0_i32, %c0_i32_0 : i32, i32
  }
  func.func @transform_6(%arg0: i32) -> (i32, i32) {
    %c0_i32 = arith.constant 0 : i32
    %c0_i32_0 = arith.constant 0 : i32
    %c0_i32_1 = arith.constant 0 : i32
    return %c0_i32, %c0_i32_0 : i32, i32
  }
  func.func @transform_7(%arg0: i32) -> (i32, i32) {
    %c0_i32 = arith.constant 0 : i32
    %c0_i32_0 = arith.constant 0 : i32
    return %c0_i32, %arg0 : i32, i32
  }
}

</mosaic_0001>

<bundles_post_ra>
// kernel: _forward_impl.1
= control target key start
LH: loop header
LB: loop body
LE: loop exit
PB: predicated region body
PF: predicated region fallthrough
CT: control target
= control target key end

     0   :  { %v546_v0 = vmov 1   ;;  %v547_v4 = vmov 0   ;;  %v53_v15 = vlaneseq  ;;  %vm291_vm0 = vcmask 261120   ;;  %s666_s1 = inlined_call_operand.vmem [shape: f32[32,2], index: 1, kind: input, shape index: {}]   ;;  %s667_s2 = inlined_call_operand.vmem [shape: f32[32,1], index: 2, kind: input, shape index: {}]   ;;  %s668_s4 = inlined_call_operand.vmem [shape: f32[32,1], index: 4, kind: input, shape index: {}]   ;;  %s669_s6 = inlined_call_operand.vmem [shape: f32[8,1], index: 6, kind: input, shape index: {}]   ;;  %s670_s3 = inlined_call_operand.vmem [shape: bf16[32,32], index: 3, kind: input, shape index: {}]   ;;  %s671_s0 = inlined_call_operand.vmem [shape: f32[2,512], index: 0, kind: input, shape index: {}]   ;;  %s672_s5 = inlined_call_operand.vmem [shape: bf16[8,32], index: 5, kind: input, shape index: {}]   ;;  %s673_s7 = inlined_call_operand.vmem [shape: f32[8,512], index: 7, kind: output, shape index: {}]  }
   0x1   :  { %540 = vset.pattern.permute.xlu0 %v546_v0  ;;  %538 = vset.pattern.permute.xlu1 %v546_v0  ;;  %v30_v1 = vld [vmem:[%s666_s1 + $0x10] sm:$0xff]  ;;  %v28_v2 = vld [vmem:[%s666_s1] sm:$0xff]  ;;  %v29_v3 = vld [vmem:[%s666_s1 + $0x8] sm:$0xff] }
   0x2   :  { %114 = vperm.xlu0 %540, %v30_v1   ;;  %106 = vperm.xlu1 %538, %v28_v2   ;;  %v31_v5 = vld [vmem:[%s666_s1 + $0x18] sm:$0xff]  ;;  %v190_v6 = vld [vmem:[%s667_s2 + $0x8] sm:$0xff]  ;;  %v189_v7 = vld [vmem:[%s667_s2] sm:$0xff]  ;;  %v54_v16 = vshrl.u32 %v53_v15, 7 }
   0x3   :  { %330 = vmatprep.mubr.bf16.mxu0 %v547_v4  ;;  %383 = vmatprep.mubr.bf16.mxu1 %v547_v4  ;;  %v257_v8 = vld [vmem:[%s668_s4] sm:$0xff]  ;;  %v191_v9 = vld [vmem:[%s667_s2 + $0x10] sm:$0xff]  ;;  %v192_v11 = vld [vmem:[%s667_s2 + $0x18] sm:$0xff] }
   0x4   :  { %v259_v10 = vld [vmem:[%s668_s4 + $0x10] sm:$0xff]  ;;  %v429_v12 = vld [vmem:[%s669_s6] sm:$0xff]  ;;  %v258_v13 = vld [vmem:[%s668_s4 + $0x8] sm:$0xff]  ;;  %v123_v17 = vsub.s32 1, %v54_v16  ;;  %v127_v18 = vsub.s32 3, %v54_v16  ;;  %v131_v19 = vsub.s32 5, %v54_v16 }
   0x5   :  { %v260_v14 = vld [vmem:[%s668_s4 + $0x18] sm:$0xff]  ;;  %v135_v20 = vsub.s32 7, %v54_v16  ;;  %v27_v21 = vld [vmem:[%s671_s0] sm:$0xff]  ;;  %v55_v22 = vsub.s32 0, %v54_v16  ;;  %v59_v23 = vsub.s32 2, %v54_v16  ;;  %v63_v24 = vsub.s32 4, %v54_v16 }
   0x6   :  { %541 = vset.pattern.permute.xlu0 %v547_v4  ;;  %110 = vperm.xlu1 %538, %v29_v3   ;;  %v67_v25 = vsub.s32 6, %v54_v16  ;;  %v124_v28 = vrot.slane %v27_v21, %v123_v17  ;;  %v128_v29 = vrot.slane %v27_v21, %v127_v18  ;;  %v132_v30 = vrot.slane %v27_v21, %v131_v19 }
   0x7   :  { %34 = vperm.xlu0 %541, %v28_v2   ;;  %v136_v31 = vrot.slane %v27_v21, %v135_v20  ;;  %v56_v32 = vrot.slane %v27_v21, %v55_v22  ;;  %v60_v33 = vrot.slane %v27_v21, %v59_v23  ;;  %v64_v34 = vrot.slane %v27_v21, %v63_v24 }
   0x8   :  { %v68_v35 = vrot.slane %v27_v21, %v67_v25  ;;  %v144_v37 = vrot.slane %v124_v28, %v123_v17  ;;  %v148_v38 = vrot.slane %v128_v29, %v123_v17  ;;  %v152_v39 = vrot.slane %v132_v30, %v123_v17 }
   0x9   :  { %v156_v40 = vrot.slane %v136_v31, %v123_v17  ;;  %v76_v42 = vrot.slane %v56_v32, %v55_v22  ;;  %v80_v43 = vrot.slane %v60_v33, %v55_v22  ;;  %v84_v44 = vrot.slane %v64_v34, %v55_v22 }
   0xa   :  { %539 = vset.pattern.permute.xlu1 %v547_v4  ;;  %v88_v45 = vrot.slane %v68_v35, %v55_v22 }
   0xb   :  { %39 = vperm.xlu0 %541, %v29_v3   ;;  %49 = vperm.xlu1 %539, %v31_v5  }
   0xf   :  { %44 = vperm.xlu0 %541, %v30_v1   ;;  %542 = vset.pattern.permute.xlu1 %v546_v0 }
  0x10   :  { %118 = vperm.xlu1 %542, %v31_v5  }
  0x13   :  { %200 = vperm.xlu0 %541, %v190_v6  }
  0x14   :  { %543 = vset.pattern.permute.xlu1 %v547_v4 }
  0x15   :  { %195 = vperm.xlu1 %543, %v189_v7  }
  0x17   :  { %263 = vperm.xlu0 %541, %v257_v8  }
  0x19   :  { %205 = vperm.xlu1 %543, %v191_v9  }
  0x1b   :  { %273 = vperm.xlu0 %541, %v259_v10  }
  0x1d   :  { %210 = vperm.xlu1 %543, %v192_v11  }
  0x1f   :  { %432 = vperm.xlu0 %541, %v429_v12  }
  0x21   :  { %268 = vperm.xlu1 %543, %v258_v13  }
  0x25   :  { %278 = vperm.xlu1 %543, %v260_v14  }
  0x81   :  { %v107_v26 = vpop.permute.xlu1 %106  ;;  %v115_v27 = vpop.permute.xlu0 %114 }
  0x82   :  { %v157_v46 = vmul.f32 %v144_v37, %v107_v26  ;;  %v158_v47 = vmul.f32 %v148_v38, %v107_v26  ;;  %v159_v48 = vmul.f32 %v152_v39, %v107_v26  ;;  %v160_v49 = vmul.f32 %v156_v40, %v107_v26 }
  0x83   :  { %v165_v56 = vmul.f32 %v144_v37, %v115_v27  ;;  %v166_v57 = vmul.f32 %v148_v38, %v115_v27  ;;  %v167_v58 = vmul.f32 %v152_v39, %v115_v27  ;;  %v168_v59 = vmul.f32 %v156_v40, %v115_v27 }
  0x85   :  { %v111_v36 = vpop.permute.xlu1 %110 }
  0x86   :  { %v35_v41 = vpop.permute.xlu0 %34  ;;  %v161_v60 = vmul.f32 %v144_v37, %v111_v36  ;;  %v162_v61 = vmul.f32 %v148_v38, %v111_v36  ;;  %v163_v0 = vmul.f32 %v152_v39, %v111_v36  ;;  %v164_v1 = vmul.f32 %v156_v40, %v111_v36 }
  0x87   :  { %v89_v52 = vmul.f32 %v76_v42, %v35_v41  ;;  %v90_v53 = vmul.f32 %v80_v43, %v35_v41  ;;  %v91_v54 = vmul.f32 %v84_v44, %v35_v41  ;;  %v92_v55 = vmul.f32 %v88_v45, %v35_v41 }
  0x89   :  { %v174_v7 = vadd.f32 %v158_v47, %v90_v53  ;;  %v176_v8 = vadd.f32 %v160_v49, %v92_v55  ;;  %v173_v9 = vadd.f32 %v157_v46, %v89_v52  ;;  %v175_v10 = vadd.f32 %v159_v48, %v91_v54 }
  0x8a   :  { %v40_v50 = vpop.permute.xlu0 %39  ;;  %v50_v51 = vpop.permute.xlu1 %49 }
  0x8b   :  { %v94_v62 = vmul.f32 %v80_v43, %v40_v50  ;;  %v96_v63 = vmul.f32 %v88_v45, %v40_v50  ;;  %v93_v2 = vmul.f32 %v76_v42, %v40_v50  ;;  %v95_v3 = vmul.f32 %v84_v44, %v40_v50 }
  0x8c   :  { %v101_v11 = vmul.f32 %v76_v42, %v50_v51  ;;  %v102_v12 = vmul.f32 %v80_v43, %v50_v51  ;;  %v103_v13 = vmul.f32 %v84_v44, %v50_v51  ;;  %v104_v14 = vmul.f32 %v88_v45, %v50_v51 }
  0x8d   :  { %v178_v17 = vadd.f32 %v162_v61, %v94_v62  ;;  %v180_v18 = vadd.f32 %v164_v1, %v96_v63  ;;  %v177_v22 = vadd.f32 %v161_v60, %v93_v2  ;;  %v179_v23 = vadd.f32 %v163_v0, %v95_v3 }
  0x8e   :  { %v45_v5 = vpop.permute.xlu0 %44 }
  0x8f   :  { %v119_v6 = vpop.permute.xlu1 %118  ;;  %v97_v15 = vmul.f32 %v76_v42, %v45_v5  ;;  %v98_v16 = vmul.f32 %v80_v43, %v45_v5  ;;  %v99_v19 = vmul.f32 %v84_v44, %v45_v5  ;;  %v100_v20 = vmul.f32 %v88_v45, %v45_v5 }
  0x90   :  { %v169_v24 = vmul.f32 %v144_v37, %v119_v6  ;;  %v170_v25 = vmul.f32 %v148_v38, %v119_v6  ;;  %v171_v28 = vmul.f32 %v152_v39, %v119_v6  ;;  %v172_v29 = vmul.f32 %v156_v40, %v119_v6 }
  0x91   :  { %v181_v33 = vadd.f32 %v165_v56, %v97_v15  ;;  %v182_v34 = vadd.f32 %v166_v57, %v98_v16  ;;  %v183_v41 = vadd.f32 %v167_v58, %v99_v19  ;;  %v184_v42 = vadd.f32 %v168_v59, %v100_v20  ;;  %v544_v16 = vld [vmem:[%s670_s3] sm:$0xff]  }
  0x92   :  { %v201_v21 = vpop.permute.xlu0 %200  ;;  %v185_v58 = vadd.f32 %v169_v24, %v101_v11  ;;  %v186_v59 = vadd.f32 %v170_v25, %v102_v12  ;;  %v187_v60 = vadd.f32 %v171_v28, %v103_v13  ;;  %v188_v61 = vadd.f32 %v172_v29, %v104_v14 }
  0x93   :  { %v218_v26 = vadd.f32 %v201_v21, %v178_v17  ;;  %v220_v27 = vadd.f32 %v201_v21, %v180_v18  ;;  %v217_v31 = vadd.f32 %v201_v21, %v177_v22  ;;  %v219_v32 = vadd.f32 %v201_v21, %v179_v23  ;;  %v545_v17 = vld [vmem:[%s670_s3 + $0x8] sm:$0xff]  }
  0x94   :  { %v196_v30 = vpop.permute.xlu1 %195 }
  0x95   :  { %v214_v35 = vadd.f32 %v196_v30, %v174_v7  ;;  %v216_v36 = vadd.f32 %v196_v30, %v176_v8  ;;  %v213_v43 = vadd.f32 %v196_v30, %v173_v9  ;;  %v215_v44 = vadd.f32 %v196_v30, %v175_v10 }
  0x96   :  { %v234_v46 = vmax.f32 %v218_v26, 0.0  ;;  %v236_v37 = vmax.f32 %v220_v27, 0.0  ;;  %v233_v49 = vmax.f32 %v217_v31, 0.0  ;;  %v235_v40 = vmax.f32 %v219_v32, 0.0  ;;  %v264_v18 = vpop.permute.xlu0 %263 }
  0x97   :  { %v230_v45 = vmax.f32 %v214_v35, 0.0  ;;  %v232_v47 = vmax.f32 %v216_v36, 0.0  ;;  %v229_v48 = vmax.f32 %v213_v43, 0.0  ;;  %v231_v39 = vmax.f32 %v215_v44, 0.0 }
  0x98   :  { %v206_v38 = vpop.permute.xlu1 %205 }
  0x99   :  { %v221_v50 = vadd.f32 %v206_v38, %v181_v33  ;;  %v222_v51 = vadd.f32 %v206_v38, %v182_v34  ;;  %v223_v52 = vadd.f32 %v206_v38, %v183_v41  ;;  %v224_v53 = vadd.f32 %v206_v38, %v184_v42 }
  0x9a   :  { %v246_v54 = vpack.c.bf16 %v234_v46, %v230_v45  ;;  %v248_v55 = vpack.c.bf16 %v236_v37, %v232_v47  ;;  %v245_v56 = vpack.c.bf16 %v233_v49, %v229_v48  ;;  %v247_v57 = vpack.c.bf16 %v235_v40, %v231_v39  ;;  %v274_v47 = vpop.permute.xlu0 %273 }
  0x9b   :  { %v238_v3 = vmax.f32 %v222_v51, 0.0  ;;  %v240_v5 = vmax.f32 %v224_v53, 0.0  ;;  %v237_v6 = vmax.f32 %v221_v50, 0.0  ;;  %v239_v7 = vmax.f32 %v223_v52, 0.0 }
  0x9c   :  { %298 = vmatprep.subr.bf16.mxu0 %v246_v54  ;;  %351 = vmatprep.subr.bf16.mxu1 %v248_v55  ;;  %v211_v62 = vpop.permute.xlu1 %210 }
  0x9d   :  { %v225_v63 = vadd.f32 %v211_v62, %v185_v58  ;;  %v226_v0 = vadd.f32 %v211_v62, %v186_v59  ;;  %v227_v1 = vadd.f32 %v211_v62, %v187_v60  ;;  %v228_v2 = vadd.f32 %v211_v62, %v188_v61  ;;  %299 = vmatpush1.bf16.msra.mxu0 %v245_v56 }
  0x9e   :  { %352 = vmatpush1.bf16.msra.mxu1 %v247_v57 }
  0x9f   :  { %v242_v8 = vmax.f32 %v226_v0, 0.0  ;;  %v244_v9 = vmax.f32 %v228_v2, 0.0  ;;  %v241_v10 = vmax.f32 %v225_v63, 0.0  ;;  %v243_v11 = vmax.f32 %v227_v1, 0.0 }
  0xa0   :  { %v269_v19 = vpop.permute.xlu1 %268 }
  0xa1   :  { %v250_v12 = vpack.c.bf16 %v242_v8, %v238_v3  ;;  %v252_v13 = vpack.c.bf16 %v244_v9, %v240_v5  ;;  %v249_v14 = vpack.c.bf16 %v241_v10, %v237_v6  ;;  %v251_v15 = vpack.c.bf16 %v243_v11, %v239_v7 }
  0xa3   :  { %300 = vmatprep.subr.bf16.mxu0 %v250_v12  ;;  %353 = vmatprep.subr.bf16.mxu1 %v252_v13 }
  0xa4   :  { %301 = vmatpush1.bf16.msra.mxu0 %v249_v14  ;;  %354 = vmatpush1.bf16.msra.mxu1 %v251_v15  ;;  %v279_v37 = vpop.permute.xlu1 %278  ;;  %v428_v14 = vld [vmem:[%s672_s5] sm:$0xf]  ;;  %v433_v15 = vpop.permute.xlu0 %432 }
  0xa7   :  { %530 = vmatmul.mubr.msk.bf16.vlgmr.msra.gmra.mrb[0].mxu0 %vm291_vm0, %v544_v16  ;;  %532 = vmatmul.mubr.msk.bf16.vlgmr.msra.gmra.mrb[0].mxu1 %vm291_vm0, %v544_v16 }
  0xa8   :  { %340 = vmatprep.mubr.bf16.mxu0 %v547_v4  ;;  %393 = vmatprep.mubr.bf16.mxu1 %v547_v4 }
  0xaf   :  { %531 = vmatmul.mubr.msk.bf16.gmra.mrb[4].mxu0 %vm291_vm0, %v545_v17  ;;  %533 = vmatmul.mubr.msk.bf16.gmra.mrb[4].mxu1 %vm291_vm0, %v545_v17 }
  0xb0   :  { %470 = vmatprep.mubr.bf16.mxu0 %v547_v4  ;;  %511 = vmatprep.mubr.bf16.mxu1 %v547_v4 }
 0x17a   :  { %v332_v20 = vpop.f32.mrb[0].mxu0  ;;  %v385_v21 = vpop.f32.mrb[0].mxu1 }
 0x17b   :  { %v333_v22 = vadd.f32 %v332_v20, %v264_v18  ;;  %v386_v23 = vadd.f32 %v385_v21, %v264_v18  ;;  %v334_v24 = vpop.f32.mrb[1].mxu0  ;;  %v387_v25 = vpop.f32.mrb[1].mxu1 }
 0x17c   :  { %v335_v26 = vadd.f32 %v334_v24, %v264_v18  ;;  %v388_v27 = vadd.f32 %v387_v25, %v264_v18  ;;  %v336_v28 = vpop.f32.mrb[2].mxu0  ;;  %v389_v29 = vpop.f32.mrb[2].mxu1 }
 0x17d   :  { %v337_v30 = vadd.f32 %v336_v28, %v269_v19  ;;  %v390_v31 = vadd.f32 %v389_v29, %v269_v19  ;;  %v338_v32 = vpop.f32.mrb[3].mxu0  ;;  %v391_v33 = vpop.f32.mrb[3].mxu1  ;;  %v404_v36 = vmax.f32 %v333_v22, 0.0  ;;  %v406_v4 = vmax.f32 %v386_v23, 0.0 }
 0x17e   :  { %v339_v34 = vadd.f32 %v338_v32, %v269_v19  ;;  %v392_v35 = vadd.f32 %v391_v33, %v269_v19  ;;  %v405_v43 = vmax.f32 %v335_v26, 0.0  ;;  %v407_v44 = vmax.f32 %v388_v27, 0.0 }
 0x17f   :  { %v408_v41 = vmax.f32 %v337_v30, 0.0  ;;  %v410_v42 = vmax.f32 %v390_v31, 0.0 }
 0x180   :  { %v409_v45 = vmax.f32 %v339_v34, 0.0  ;;  %v411_v46 = vmax.f32 %v392_v35, 0.0 }
 0x181   :  { %v420_v38 = vpack.c.bf16 %v408_v41, %v404_v36  ;;  %v422_v48 = vpack.c.bf16 %v410_v42, %v406_v4 }
 0x182   :  { %v421_v49 = vpack.c.bf16 %v409_v45, %v405_v43  ;;  %v423_v39 = vpack.c.bf16 %v411_v46, %v407_v44  ;;  %v342_v40 = vpop.f32.mrb[4].mxu0  ;;  %v395_v50 = vpop.f32.mrb[4].mxu1 }
 0x183   :  { %v343_v51 = vadd.f32 %v342_v40, %v274_v47  ;;  %v396_v52 = vadd.f32 %v395_v50, %v274_v47  ;;  %v344_v53 = vpop.f32.mrb[5].mxu0  ;;  %v397_v54 = vpop.f32.mrb[5].mxu1 }
 0x184   :  { %v345_v55 = vadd.f32 %v344_v53, %v274_v47  ;;  %v398_v56 = vadd.f32 %v397_v54, %v274_v47  ;;  %v346_v57 = vpop.f32.mrb[6].mxu0  ;;  %v399_v58 = vpop.f32.mrb[6].mxu1  ;;  %438 = vmatprep.subr.bf16.mxu0 %v421_v49  ;;  %479 = vmatprep.subr.bf16.mxu1 %v423_v39 }
 0x185   :  { %v347_v59 = vadd.f32 %v346_v57, %v279_v37  ;;  %v400_v60 = vadd.f32 %v399_v58, %v279_v37  ;;  %v348_v61 = vpop.f32.mrb[7].mxu0  ;;  %v401_v62 = vpop.f32.mrb[7].mxu1  ;;  %439 = vmatpush1.bf16.msra.mxu0 %v420_v38  ;;  %480 = vmatpush1.bf16.msra.mxu1 %v422_v48  ;;  %v412_v1 = vmax.f32 %v343_v51, 0.0  ;;  %v414_v2 = vmax.f32 %v396_v52, 0.0 }
 0x186   :  { %v349_v63 = vadd.f32 %v348_v61, %v279_v37  ;;  %v402_v0 = vadd.f32 %v401_v62, %v279_v37  ;;  %v413_v6 = vmax.f32 %v345_v55, 0.0  ;;  %v415_v7 = vmax.f32 %v398_v56, 0.0 }
 0x187   :  { %v416_v3 = vmax.f32 %v347_v59, 0.0  ;;  %v418_v5 = vmax.f32 %v400_v60, 0.0 }
 0x188   :  { %v417_v8 = vmax.f32 %v349_v63, 0.0  ;;  %v419_v9 = vmax.f32 %v402_v0, 0.0 }
 0x189   :  { %v424_v10 = vpack.c.bf16 %v416_v3, %v412_v1  ;;  %v426_v11 = vpack.c.bf16 %v418_v5, %v414_v2 }
 0x18a   :  { %v425_v12 = vpack.c.bf16 %v417_v8, %v413_v6  ;;  %v427_v13 = vpack.c.bf16 %v419_v9, %v415_v7 }
 0x18c   :  { %440 = vmatprep.subr.bf16.mxu0 %v425_v12  ;;  %481 = vmatprep.subr.bf16.mxu1 %v427_v13 }
 0x18d   :  { %441 = vmatpush1.bf16.msra.mxu0 %v424_v10  ;;  %482 = vmatpush1.bf16.msra.mxu1 %v426_v11 }
 0x190   :  { %534 = vmatmul.mubr.msk.bf16.vlgmr.msra.gmra.mrb[8].mxu0 %vm291_vm0, %v428_v14  ;;  %535 = vmatmul.mubr.msk.bf16.vlgmr.msra.gmra.mrb[8].mxu1 %vm291_vm0, %v428_v14 }
 0x263   :  { %v472_v16 = vpop.f32.mrb[8].mxu0  ;;  %v513_v17 = vpop.f32.mrb[8].mxu1 }
 0x264   :  { %v473_v18 = vadd.f32 %v472_v16, %v433_v15  ;;  %v514_v19 = vadd.f32 %v513_v17, %v433_v15  ;;  %v474_v20 = vpop.f32.mrb[9].mxu0  ;;  %v515_v21 = vpop.f32.mrb[9].mxu1 }
 0x265   :  { %v475_v22 = vadd.f32 %v474_v20, %v433_v15  ;;  %v516_v23 = vadd.f32 %v515_v21, %v433_v15  ;;  %v476_v24 = vpop.f32.mrb[10].mxu0  ;;  %v517_v25 = vpop.f32.mrb[10].mxu1 }
 0x266   :  { %520 = vst [vmem:[%s673_s7] sm:$0xff] %v473_v18  ;;  %522 = vst [vmem:[%s673_s7 + $0x10] sm:$0xff] %v514_v19  ;;  %v477_v26 = vpop.f32.mrb[11].mxu0  ;;  %v518_v27 = vpop.f32.mrb[11].mxu1 }
 0x267   :  { %521 = vst [vmem:[%s673_s7 + $0x8] sm:$0xff] %v475_v22  ;;  %523 = vst [vmem:[%s673_s7 + $0x18] sm:$0xff] %v516_v23 }

</bundles_post_ra>
